<compile_context>
chip_gen: v7x
topology: tpu7x:2x2x1
jax: 0.10.0
libtpu: 0.0.40
codegen_flags: <defaults>
</compile_context>

<pallas_src>
import functools

import numpy as np
import jax
import jax.numpy as jnp
from jax.experimental import pallas as pl
from jax.experimental.pallas import tpu as pltpu


# ----------------------------- weight construction -----------------------------
def _hamming_periodic(win_len):
    n = np.arange(win_len)
    return 0.54 - 0.46 * np.cos(2.0 * np.pi * n / win_len)


def init_stft_kernel(win_len, fft_len, win_type="hamming"):
    """NumPy port of init_kernels() (forward STFT basis, no pinv).

    Returns (2*(fft_len//2+1), win_len) == torch weight[:, 0, :].
    """
    if win_type is None or win_type == "None":
        window = np.ones(win_len)
    elif win_type == "hamming":
        window = _hamming_periodic(win_len)  # scipy get_window('hamming', fftbins=True)
    else:
        raise ValueError(f"unsupported win_type: {win_type}")
    N = fft_len
    fourier_basis = np.fft.rfft(np.eye(N))[:win_len]          # (win_len, N//2+1)
    real_kernel = np.real(fourier_basis)
    imag_kernel = np.imag(fourier_basis)
    kernel = np.concatenate([real_kernel, imag_kernel], 1).T  # (2*(N//2+1), win_len)
    kernel = kernel * window
    return kernel.astype(np.float32)


def make_transposed_weight(win_len, fft_len, win_type="hamming"):
    """Host-side, built once.

    Wt: (2*dim_pad, win_len). Rows [0, dim) are the real basis, rows
    [dim_pad, dim_pad+dim) the imag basis; dim_pad = round_up(dim, 8) so all
    in-kernel sublane slices stay 8-aligned. Padding rows are zero.
    """
    kernel = init_stft_kernel(win_len, fft_len, win_type)     # (2*dim, win_len)
    dim = fft_len // 2 + 1
    dim_pad = -(-dim // 8) * 8
    Wt = np.zeros((2 * dim_pad, win_len), np.float32)
    Wt[:dim, :] = kernel[:dim]                                # real basis rows
    Wt[dim_pad:dim_pad + dim, :] = kernel[dim:]               # imag basis rows
    return Wt


# ----------------------------------- kernel ------------------------------------
_ATAN_C1 = np.float32(0.99997726)
_ATAN_C3 = np.float32(-0.33262347)
_ATAN_C5 = np.float32(0.19354346)
_ATAN_C7 = np.float32(-0.11643287)
_ATAN_C9 = np.float32(0.05265332)
_ATAN_C11 = np.float32(-0.01172120)
_HALF_PI = np.float32(np.pi / 2.0)
_PI = np.float32(np.pi)


def _atan2(y, x):
    """atan2 built from VPU ops only (minimax poly on [0,1] + quadrant select).

    Max abs error ~2e-6 rad. Note: atan2(0, 0) -> 0 and signed zero of y is not
    honored (torch returns -pi for atan2(-0.0, x<0)); only affects exactly-zero
    spectral bins.
    """
    ax = jnp.abs(x)
    ay = jnp.abs(y)
    mx = jnp.maximum(ax, ay)
    mn = jnp.minimum(ax, ay)
    z = mn / jnp.where(mx == 0.0, np.float32(1.0), mx)        # in [0, 1]
    s = z * z
    p = _ATAN_C9 + s * _ATAN_C11
    p = _ATAN_C7 + s * p
    p = _ATAN_C5 + s * p
    p = _ATAN_C3 + s * p
    p = _ATAN_C1 + s * p
    a = z * p                                                 # atan(z), z in [0,1]
    a = jnp.where(ay > ax, _HALF_PI - a, a)
    a = jnp.where(x < 0.0, _PI - a, a)
    return jnp.where(y < 0.0, -a, a)


def _stft_kernel(xt_ref, wt_ref, mag_ref, ph_ref):
    # xt_ref : (1, win_len, tn)   frames^T for this (batch, frame-tile)
    # wt_ref : (2*dim_pad, win_len) fused transposed basis (real | imag halves)
    # mag_ref/ph_ref : (1, dim, tn) -- already the final NCL layout.
    out = jnp.dot(wt_ref[...], xt_ref[0],
                  preferred_element_type=jnp.float32)         # (2*dim_pad, tn)
    dp = wt_ref.shape[0] // 2
    dim = mag_ref.shape[1]
    re = out[:dp, :]                                          # sublane slice @0
    im = out[dp:, :]                                          # sublane slice @dp (8-aligned)
    mag = jnp.sqrt(re * re + im * im)
    ph = _atan2(im, re)
    mag_ref[0] = mag[:dim, :]                                 # drop zero pad rows [dim, dp)
    ph_ref[0] = ph[:dim, :]


# ---------------------------------- wrapper ------------------------------------
def _pick_tn(n_frames, tn_max=1024):
    """Frame-tile width (lane axis of all kernel I/O).

    Multiple of 128 for lane-dense unmasked stores; when n_frames < 128 use the
    exact frame count (block == full array dim satisfies the (8,128) rule and
    keeps output arrays exact -> no post-kernel slicing).
    """
    if n_frames < 128:
        return n_frames
    return min(tn_max, 128 * (n_frames // 128))


@functools.partial(jax.jit, static_argnames=("win_len", "win_inc", "fft_len", "tn"))
def conv_stft(x, wt, *, win_len, win_inc, fft_len, tn=None):
    """Equivalent of ConvSTFT.forward with feature_type='real'.

    x: (B, T) or (B, 1, T) float32; wt: weight from make_transposed_weight().
    Returns (mags, phase), each (B, fft_len//2+1, n_frames)  (PyTorch NCL layout).
    """
    if x.ndim == 3:
        x = x[:, 0, :]
    x = x.astype(jnp.float32)
    B, T = x.shape
    dim = fft_len // 2 + 1
    dim_pad = wt.shape[0] // 2
    assert wt.shape == (2 * dim_pad, win_len) and dim <= dim_pad

    pad = win_len - win_inc
    Lp = T + 2 * pad
    n_frames = (Lp - win_len) // win_inc + 1

    if tn is None:
        tn = _pick_tn(n_frames)
    n_ftiles = -(-n_frames // tn)
    F_pad = n_ftiles * tn                                     # frames fed to the kernel

    # Over-pad the signal once so framing directly yields F_pad frames (the
    # extra frames are all-zero and are dropped by the ragged output tile).
    needed = (F_pad - 1) * win_inc + win_len
    total = -(-max(needed, Lp) // win_inc) * win_inc
    xp = jnp.pad(x, ((0, 0), (pad, total - pad - T)))         # (B, total)

    # Build frames already transposed: framesT[b, k, f] = xp[b, f*win_inc + k].
    # TODO(synk): this im2col(+transpose) is still an XLA pass (~640 B/frame);
    # fusing it in-kernel needs overlapping-window DMA + in-kernel transpose.
    if win_len % win_inc == 0:
        r = win_len // win_inc
        chunks = xp.reshape(B, total // win_inc, win_inc)     # (B, NCH, win_inc)
        framesT = jnp.concatenate(
            [jnp.swapaxes(chunks[:, j:j + F_pad, :], 1, 2) for j in range(r)],
            axis=1)                                           # (B, win_len, F_pad)
    else:
        idx = (jnp.arange(F_pad)[:, None] * win_inc
               + jnp.arange(win_len)[None, :])
        framesT = jnp.swapaxes(xp[:, idx], 1, 2)              # (B, win_len, F_pad)

    grid = (B, n_ftiles)
    mags, phase = pl.pallas_call(
        _stft_kernel,
        out_shape=(
            jax.ShapeDtypeStruct((B, dim, n_frames), jnp.float32),
            jax.ShapeDtypeStruct((B, dim, n_frames), jnp.float32),
        ),
        grid_spec=pltpu.PrefetchScalarGridSpec(
            num_scalar_prefetch=0,
            grid=grid,
            in_specs=[
                # frames^T tile: (win_len, tn); last dim is lane-dense (tn).
                pl.BlockSpec((1, win_len, tn), lambda b, f: (b, 0, f)),
                # fused transposed basis, constant index -> resident in VMEM.
                pl.BlockSpec((2 * dim_pad, win_len), lambda b, f: (0, 0)),
            ],
            out_specs=[
                # dim axis = full array dim (33); frame axis tiled by tn.
                pl.BlockSpec((1, dim, tn), lambda b, f: (b, 0, f)),
                pl.BlockSpec((1, dim, tn), lambda b, f: (b, 0, f)),
            ],
        ),
        compiler_params=pltpu.CompilerParams(
            dimension_semantics=("parallel", "parallel")),
    )(framesT, wt)
    return mags, phase


# ------------------------------------ main --------------------------------------
if __name__ == "__main__":
    win_len, win_inc, fft_len = 64, 16, 64
    Wt = jnp.asarray(make_transposed_weight(win_len, fft_len, "hamming"))

    key = jax.random.PRNGKey(0)
    x = jax.random.normal(key, (2, 256), dtype=jnp.float32)   # (B, T) audio

    mags, phase = conv_stft(x, Wt, win_len=win_len, win_inc=win_inc, fft_len=fft_len)
    mags, phase = jax.block_until_ready((mags, phase))

    # sanity check against a pure-JAX reference of the conv-STFT
    kernel_np = init_stft_kernel(win_len, fft_len, "hamming")
    pad = win_len - win_inc
    xp = jnp.pad(x, ((0, 0), (pad, pad)))
    n_frames = (xp.shape[1] - win_len) // win_inc + 1
    idx = jnp.arange(n_frames)[:, None] * win_inc + jnp.arange(win_len)[None, :]
    frames = xp[:, idx]                                       # (B, n_frames, win_len)
    out_ref = jnp.einsum("bfk,ck->bcf", frames, jnp.asarray(kernel_np))
    dim = fft_len // 2 + 1
    mags_ref = np.asarray(jnp.sqrt(out_ref[:, :dim] ** 2 + out_ref[:, dim:] ** 2))
    phase_ref = np.asarray(jnp.arctan2(out_ref[:, dim:], out_ref[:, :dim]))

    assert mags.shape == (2, dim, n_frames) and phase.shape == (2, dim, n_frames)
    np.testing.assert_allclose(np.asarray(mags), mags_ref, atol=2e-4, rtol=2e-4)
    # Phase: compare as a wrapped angular difference (robust to +/-pi sign flips)
    # and only where the magnitude is well away from zero (phase is ill-conditioned
    # for near-silent bins; kernel atan2 itself is accurate to ~2e-6 rad).
    dphi = np.asarray(phase) - phase_ref
    dphi = np.abs((dphi + np.pi) % (2.0 * np.pi) - np.pi)
    mask = mags_ref > 1e-2
    assert dphi[mask].max() < 5e-4, f"phase mismatch: {dphi[mask].max()}"

    print("KERNEL_OK")
</pallas_src>

<mosaic_0001>
module attributes {stable_mosaic.version = 11 : i64} {
  func.func @_stft_kernel(%arg0: i32, %arg1: i32, %arg2: memref<1x64x19xf32, #tpu.memory_space<vmem>>, %arg3: memref<80x64xf32, #tpu.memory_space<vmem>>, %arg4: memref<1x33x19xf32, #tpu.memory_space<vmem>>, %arg5: memref<1x33x19xf32, #tpu.memory_space<vmem>>) attributes {dimension_semantics = [#tpu.dimension_semantics<parallel>, #tpu.dimension_semantics<parallel>], iteration_bounds = array<i64: 2, 1>, scalar_prefetch = 0 : i64, scratch_operands = 0 : i64, tpu.core_type = #tpu.core_type<tc>, window_params = [{transform_indices = @transform_0, window_bounds = array<i64: 1, 64, 19>}, {pipeline_mode = #tpu.pipeline_mode<synchronous>, transform_indices = @transform_1, window_bounds = array<i64: 80, 64>}, {transform_indices = @transform_2, window_bounds = array<i64: 1, 33, 19>}, {transform_indices = @transform_3, window_bounds = array<i64: 1, 33, 19>}]} {
    %c0 = arith.constant 0 : index
    %c0_0 = arith.constant 0 : index
    %0 = vector.load %arg3[%c0, %c0_0] : memref<80x64xf32, #tpu.memory_space<vmem>>, vector<80x64xf32>
    %c0_1 = arith.constant 0 : index
    %c0_2 = arith.constant 0 : index
    %c0_3 = arith.constant 0 : index
    %1 = vector.load %arg2[%c0_1, %c0_2, %c0_3] : memref<1x64x19xf32, #tpu.memory_space<vmem>>, vector<1x64x19xf32>
    %2 = vector.shape_cast %1 : vector<1x64x19xf32> to vector<64x19xf32>
    %cst = arith.constant dense<0.000000e+00> : vector<80x19xf32>
    %3 = tpu.matmul %0, %2, %cst {dimension_numbers = #tpu.dot_dimension_numbers<[1], [0], [0], [1], [0, 0, 1, 1], [], []>} : vector<80x64xf32>, vector<64x19xf32>, vector<80x19xf32> -> vector<80x19xf32>
    %4 = vector.extract_strided_slice %3 {offsets = [0, 0], sizes = [40, 19], strides = [1, 1]} : vector<80x19xf32> to vector<40x19xf32>
    %5 = vector.extract_strided_slice %3 {offsets = [40, 0], sizes = [40, 19], strides = [1, 1]} : vector<80x19xf32> to vector<40x19xf32>
    %6 = arith.mulf %4, %4 : vector<40x19xf32>
    %7 = arith.mulf %5, %5 : vector<40x19xf32>
    %8 = arith.addf %6, %7 : vector<40x19xf32>
    %9 = math.sqrt %8 : vector<40x19xf32>
    %10 = math.absf %4 : vector<40x19xf32>
    %11 = math.absf %5 : vector<40x19xf32>
    %12 = arith.maximumf %10, %11 : vector<40x19xf32>
    %13 = arith.minimumf %10, %11 : vector<40x19xf32>
    %cst_4 = arith.constant 0.000000e+00 : f32
    %14 = vector.broadcast %cst_4 : f32 to vector<40x19xf32>
    %15 = arith.cmpf oeq, %12, %14 : vector<40x19xf32>
    %cst_5 = arith.constant 1.000000e+00 : f32
    %16 = vector.broadcast %cst_5 : f32 to vector<40x19xf32>
    %17 = arith.select %15, %16, %12 : vector<40x19xi1>, vector<40x19xf32>
    %18 = arith.divf %13, %17 : vector<40x19xf32>
    %19 = arith.mulf %18, %18 : vector<40x19xf32>
    %cst_6 = arith.constant -1.172120e-02 : f32
    %20 = vector.broadcast %cst_6 : f32 to vector<40x19xf32>
    %21 = arith.mulf %19, %20 : vector<40x19xf32>
    %cst_7 = arith.constant 0.0526533201 : f32
    %22 = vector.broadcast %cst_7 : f32 to vector<40x19xf32>
    %23 = arith.addf %22, %21 : vector<40x19xf32>
    %24 = arith.mulf %19, %23 : vector<40x19xf32>
    %cst_8 = arith.constant -0.116432868 : f32
    %25 = vector.broadcast %cst_8 : f32 to vector<40x19xf32>
    %26 = arith.addf %25, %24 : vector<40x19xf32>
    %27 = arith.mulf %19, %26 : vector<40x19xf32>
    %cst_9 = arith.constant 0.193543464 : f32
    %28 = vector.broadcast %cst_9 : f32 to vector<40x19xf32>
    %29 = arith.addf %28, %27 : vector<40x19xf32>
    %30 = arith.mulf %19, %29 : vector<40x19xf32>
    %cst_10 = arith.constant -0.332623482 : f32
    %31 = vector.broadcast %cst_10 : f32 to vector<40x19xf32>
    %32 = arith.addf %31, %30 : vector<40x19xf32>
    %33 = arith.mulf %19, %32 : vector<40x19xf32>
    %cst_11 = arith.constant 0.999977231 : f32
    %34 = vector.broadcast %cst_11 : f32 to vector<40x19xf32>
    %35 = arith.addf %34, %33 : vector<40x19xf32>
    %36 = arith.mulf %18, %35 : vector<40x19xf32>
    %37 = arith.cmpf ogt, %11, %10 : vector<40x19xf32>
    %cst_12 = arith.constant 1.57079637 : f32
    %38 = vector.broadcast %cst_12 : f32 to vector<40x19xf32>
    %39 = arith.subf %38, %36 : vector<40x19xf32>
    %40 = arith.select %37, %39, %36 : vector<40x19xi1>, vector<40x19xf32>
    %cst_13 = arith.constant 0.000000e+00 : f32
    %41 = vector.broadcast %cst_13 : f32 to vector<40x19xf32>
    %42 = arith.cmpf olt, %4, %41 : vector<40x19xf32>
    %cst_14 = arith.constant 3.14159274 : f32
    %43 = vector.broadcast %cst_14 : f32 to vector<40x19xf32>
    %44 = arith.subf %43, %40 : vector<40x19xf32>
    %45 = arith.select %42, %44, %40 : vector<40x19xi1>, vector<40x19xf32>
    %cst_15 = arith.constant 0.000000e+00 : f32
    %46 = vector.broadcast %cst_15 : f32 to vector<40x19xf32>
    %47 = arith.cmpf olt, %5, %46 : vector<40x19xf32>
    %cst_16 = arith.constant 0.000000e+00 : f32
    %48 = vector.broadcast %cst_16 : f32 to vector<40x19xf32>
    %49 = arith.subf %48, %45 : vector<40x19xf32>
    %50 = arith.select %47, %49, %45 : vector<40x19xi1>, vector<40x19xf32>
    %51 = vector.extract_strided_slice %9 {offsets = [0, 0], sizes = [33, 19], strides = [1, 1]} : vector<40x19xf32> to vector<33x19xf32>
    %c0_17 = arith.constant 0 : index
    %c0_18 = arith.constant 0 : index
    %c0_19 = arith.constant 0 : index
    %52 = vector.load %arg4[%c0_17, %c0_18, %c0_19] : memref<1x33x19xf32, #tpu.memory_space<vmem>>, vector<1x33x19xf32>
    %53 = vector.shape_cast %52 : vector<1x33x19xf32> to vector<33x19xf32>
    %54 = vector.shape_cast %51 : vector<33x19xf32> to vector<1x33x19xf32>
    tpu.vector_store %arg4[%c0_17, %c0_18, %c0_19], %54 {strides = array<i32>} : memref<1x33x19xf32, #tpu.memory_space<vmem>>, vector<1x33x19xf32>,
    %55 = vector.extract_strided_slice %50 {offsets = [0, 0], sizes = [33, 19], strides = [1, 1]} : vector<40x19xf32> to vector<33x19xf32>
    %c0_20 = arith.constant 0 : index
    %c0_21 = arith.constant 0 : index
    %c0_22 = arith.constant 0 : index
    %56 = vector.load %arg5[%c0_20, %c0_21, %c0_22] : memref<1x33x19xf32, #tpu.memory_space<vmem>>, vector<1x33x19xf32>
    %57 = vector.shape_cast %56 : vector<1x33x19xf32> to vector<33x19xf32>
    %58 = vector.shape_cast %55 : vector<33x19xf32> to vector<1x33x19xf32>
    tpu.vector_store %arg5[%c0_20, %c0_21, %c0_22], %58 {strides = array<i32>} : memref<1x33x19xf32, #tpu.memory_space<vmem>>, vector<1x33x19xf32>,
    return
  }
  func.func @transform_0(%arg0: i32, %arg1: i32) -> (i32, i32, i32) {
    %c0_i32 = arith.constant 0 : i32
    %c0_i32_0 = arith.constant 0 : i32
    return %arg0, %c0_i32, %arg1 : i32, i32, i32
  }
  func.func @transform_1(%arg0: i32, %arg1: i32) -> (i32, i32) {
    %c0_i32 = arith.constant 0 : i32
    %c0_i32_0 = arith.constant 0 : i32
    %c0_i32_1 = arith.constant 0 : i32
    return %c0_i32, %c0_i32_0 : i32, i32
  }
  func.func @transform_2(%arg0: i32, %arg1: i32) -> (i32, i32, i32) {
    %c0_i32 = arith.constant 0 : i32
    %c0_i32_0 = arith.constant 0 : i32
    return %arg0, %c0_i32, %arg1 : i32, i32, i32
  }
  func.func @transform_3(%arg0: i32, %arg1: i32) -> (i32, i32, i32) {
    %c0_i32 = arith.constant 0 : i32
    %c0_i32_0 = arith.constant 0 : i32
    return %arg0, %c0_i32, %arg1 : i32, i32, i32
  }
}

</mosaic_0001>

<bundles_post_ra>
// kernel: conv_stft.1
= control target key start
LH: loop header
LB: loop body
LE: loop exit
PB: predicated region body
PF: predicated region fallthrough
CT: control target
= control target key end

     0   :  { %s908_s12 = smov 0   ;;  %s910_s13 = smov 0   ;;  %s1226_s0 = inlined_call_operand.vmem [shape: f32[2,64,19], index: 0, kind: input, shape index: {}]   ;;  %s1227_s1 = inlined_call_operand.vmem [shape: f32[80,64], index: 1, kind: input, shape index: {}]   ;;  %s1228_s2 = inlined_call_operand.vmem [shape: f32[2,33,19], index: 2, kind: output, shape index: {0}]   ;;  %s1229_s3 = inlined_call_operand.vmem [shape: f32[2,33,19], index: 3, kind: output, shape index: {1}]  }
   0x1   :  { %s912_s14 = smov 0  }
   0x2 LB: > { %s26_s15 = sadd.s32 1, %s882_s13  ;;  %p728_p0 = scmp.ge.s32.totalorder %s886_s14, 1  ;;  %s886_s14 = sphi %s912_s14, %s14_s14   ;;  %s882_s13 = sphi %s910_s13, %s1231_s13   ;;  %s878_s12 = sphi %s908_s12, %s1230_s12  }
   0x3   : > { %p28_p1 = scmp.ge.s32.totalorder %s26_s15, 2  ;;  %p161_p2 = scmp.lt.s32.totalorder %s886_s14, 3 }
   0x5   : > { %s1233_s15 = smov (%p28_p1, %s26_s15), 0  ;;  %p162_p3 = pnand %p728_p0, %p161_p2 }
   0x6   : > { %p199_p4 = scmp.lt.s32.totalorder (!%p162_p3), %s878_s12, 1  ;;  %v223_v0 = vld [vmem:[%s1227_s1] sm:$0xff] (!%p162_p3)  ;;  %vm241_vm0 = vcmask (!%p162_p3), 523264   ;;  %v229_v1 = vld [vmem:[%s1227_s1 + $0x30] sm:$0xff] (!%p162_p3)  ;;  %v224_v14 = vld [vmem:[%s1227_s1 + $0x8] sm:$0xff] (!%p162_p3)  ;;  %vm582_vm9 = vcmask (!%p162_p3), 154624  }
   0x7   : > { %165 = sbr.rel (%p162_p3) target bundleno = 314 (0x13a), region = 28  ;;  %780 = vmatprep.mubr.msk.f32.mxu0 (!%p162_p3), %vm241_vm0, %v223_v0  ;;  %789 = vmatprep.mubr.msk.f32.mxu1 (!%p162_p3), %vm241_vm0, %v229_v1  ;;  %v230_v15 = vld [vmem:[%s1227_s1 + $0x38] sm:$0xff] (!%p162_p3)  ;;  %v225_v16 = vld [vmem:[%s1227_s1 + $0x10] sm:$0xff] (!%p162_p3)  ;;  %v231_v17 = vld [vmem:[%s1227_s1 + $0x40] sm:$0xff] (!%p162_p3) }
   0x8   : > { %v226_v18 = vld [vmem:[%s1227_s1 + $0x18] sm:$0xff] (!%p162_p3)  ;;  %v232_v19 = vld [vmem:[%s1227_s1 + $0x48] sm:$0xff] (!%p162_p3)  ;;  %v227_v20 = vld [vmem:[%s1227_s1 + $0x20] sm:$0xff] (!%p162_p3) }
   0x9   : > { %v228_v21 = vld [vmem:[%s1227_s1 + $0x28] sm:$0xff] (!%p162_p3) }
   0xe   : > { %s1235_s12 = smov (!%p199_p4, %s878_s12), 1 }
   0xf   : > { %s745_s20 = sshll.u32 %s1235_s12, 6  ;;  %s819_s17 = smul.u32 40, %s1235_s12 }
  0x10   : > { %s206_s23 = scalar_lea.vmem %s1226_s0, %s745_s20 }
  0x11   : > { %v233_v2 = vld [vmem:[%s206_s23] sm:$0xff]  ;;  %v234_v3 = vld [vmem:[%s206_s23 + $0x8] sm:$0xff]  ;;  %v235_v4 = vld [vmem:[%s206_s23 + $0x10] sm:$0xff]  ;;  %s1086_s20 = scalar_lea.vmem %s1228_s2, %s819_s17 }
  0x12   : > { %v795_v5 = vpack.c.bf16 %v234_v3, %v233_v2  ;;  %v236_v6 = vld [vmem:[%s206_s23 + $0x18] sm:$0xff]  ;;  %v237_v8 = vld [vmem:[%s206_s23 + $0x20] sm:$0xff]  ;;  %v238_v9 = vld [vmem:[%s206_s23 + $0x28] sm:$0xff] }
  0x13   : > { %v799_v7 = vpack.c.bf16 %v236_v6, %v235_v4  ;;  %v803_v10 = vpack.c.bf16 %v238_v9, %v237_v8  ;;  %v239_v11 = vld [vmem:[%s206_s23 + $0x30] sm:$0xff]  ;;  %v240_v12 = vld [vmem:[%s206_s23 + $0x38] sm:$0xff]  ;;  %s1181_s23 = scalar_lea.vmem %s1229_s3, %s819_s17 }
  0x14   : > { %796 = vmatprep.subr.bf16.mxu0 %v795_v5  ;;  %811 = vmatprep.subr.bf16.mxu1 %v795_v5  ;;  %v807_v13 = vpack.c.bf16 %v240_v12, %v239_v11 }
  0x15   : > { %798 = vmatpush3.bf16.msra.mxu0 %v795_v5  ;;  %815 = vmatpush3.bf16.msra.mxu1 %v795_v5 }
  0x16   : > { %800 = vmatprep.subr.bf16.mxu0 %v799_v7  ;;  %812 = vmatprep.subr.bf16.mxu1 %v799_v7 }
  0x19   : > { %802 = vmatpush3.bf16.msra.mxu0 %v799_v7  ;;  %816 = vmatpush3.bf16.msra.mxu1 %v799_v7 }
  0x1a   : > { %804 = vmatprep.subr.bf16.mxu0 %v803_v10  ;;  %813 = vmatprep.subr.bf16.mxu1 %v803_v10 }
  0x1d   : > { %806 = vmatpush3.bf16.msra.mxu0 %v803_v10  ;;  %817 = vmatpush3.bf16.msra.mxu1 %v803_v10 }
  0x1e   : > { %808 = vmatprep.subr.bf16.mxu0 %v807_v13  ;;  %814 = vmatprep.subr.bf16.mxu1 %v807_v13 }
  0x21   : > { %810 = vmatpush3.bf16.msra.mxu0 %v807_v13  ;;  %818 = vmatpush3.bf16.msra.mxu1 %v807_v13 }
  0x24   : > { %781 = vmatmul.mubr.msk.f32.vlgmr.msra.gmra.mrb[0].mxu0 %vm241_vm0, %v224_v14  ;;  %790 = vmatmul.mubr.msk.f32.vlgmr.msra.gmra.mrb[0].mxu1 %vm241_vm0, %v230_v15 }
  0x25   : > { %783 = vmatprep.mubr.msk.f32.mxu0 %vm241_vm0, %v225_v16  ;;  %792 = vmatprep.mubr.msk.f32.mxu1 %vm241_vm0, %v231_v17 }
  0x28   : > { %784 = vmatmul.mubr.msk.f32.gmra.mrb[2].mxu0 %vm241_vm0, %v226_v18  ;;  %793 = vmatmul.mubr.msk.f32.gmra.mrb[2].mxu1 %vm241_vm0, %v232_v19 }
  0x29   : > { %786 = vmatprep.mubr.msk.f32.mxu0 %vm241_vm0, %v227_v20 }
  0x2c   : > { %787 = vmatmul.mubr.msk.f32.gmra.mrb[4].mxu0 %vm241_vm0, %v228_v21 }
  0xf7   : > { %v972_v22 = vpop.f32.mrb[0].mxu0  ;;  %v974_v23 = vpop.f32.mrb[0].mxu1 }
  0xf8   : > { %v388_v24 = vmul.f32 %v972_v22, %v972_v22  ;;  %v979_v25 = vand.u32 2147483647, %v972_v22  ;;  %v981_v26 = vpop.f32.mrb[1].mxu0  ;;  %v983_v27 = vpop.f32.mrb[1].mxu1  ;;  %v394_v37 = vmul.f32 %v974_v23, %v974_v23  ;;  %v1009_v38 = vand.u32 2147483647, %v974_v23 }
  0xf9   : > { %v393_v28 = vmul.f32 %v983_v27, %v983_v27  ;;  %v988_v29 = vand.u32 2147483647, %v983_v27  ;;  %v387_v52 = vmul.f32 %v981_v26, %v981_v26  ;;  %v1045_v53 = vand.u32 2147483647, %v981_v26 }
  0xfb   : > { %v990_v30 = vpop.f32.mrb[2].mxu0  ;;  %v992_v31 = vpop.f32.mrb[2].mxu1  ;;  %v994_v32 = vadd.f32 %v393_v28, %v388_v24  ;;  %v448_v33 = vmax.f32 %v979_v25, %v988_v29  ;;  %v453_v34 = vmin.f32 %v979_v25, %v988_v29  ;;  %vm538_vm1 = vcmp.gt.f32.partialorder %v988_v29, %v979_v25 }
  0xfc   : > { %v1002_v35 = vpop.f32.mrb[3].mxu0  ;;  %v1004_v36 = vpop.f32.mrb[3].mxu1  ;;  %v390_v39 = vmul.f32 %v990_v30, %v990_v30  ;;  %v1026_v46 = vand.u32 2147483647, %v990_v30  ;;  %v396_v54 = vmul.f32 %v992_v31, %v992_v31  ;;  %v1063_v60 = vand.u32 2147483647, %v992_v31 }
  0xfd   : > { %844 = vrsqrt.f32 %v994_v32  ;;  %vm458_vm2 = vcmp.eq.f32.partialorder %v448_v33, 0.0  ;;  %v389_v40 = vmul.f32 %v1002_v35, %v1002_v35  ;;  %v1019_v43 = vand.u32 2147483647, %v1002_v35 }
  0xfe   : > { %v463_v42 = vsel %vm458_vm2, 1.0, %v448_v33  ;;  %v395_v44 = vmul.f32 %v1004_v36, %v1004_v36  ;;  %v1031_v48 = vand.u32 2147483647, %v1004_v36  ;;  %vm411_vm8 = vcmp.eq.f32.partialorder %v994_v32, inf }
  0xff   : > { %v1016_v41 = vpop.f32.mrb[4].mxu0  ;;  %846 = vrcp.f32 %v463_v42  ;;  %v1028_v47 = vadd.f32 %v394_v37, %v389_v40  ;;  %v449_v49 = vmax.f32 %v1019_v43, %v1009_v38  ;;  %v454_v50 = vmin.f32 %v1019_v43, %v1009_v38 }
 0x100   : > { %v1023_v45 = vpop.f32.mrb[5].mxu0  ;;  %vm539_vm3 = vcmp.gt.f32.partialorder %v1009_v38, %v1019_v43  ;;  %v1039_v51 = vadd.f32 %v395_v44, %v390_v39  ;;  %v450_v56 = vmax.f32 %v1026_v46, %v1031_v48  ;;  %v455_v57 = vmin.f32 %v1026_v46, %v1031_v48 }
 0x101   : > { %848 = vrsqrt.f32 %v1028_v47  ;;  %vm459_vm4 = vcmp.eq.f32.partialorder %v449_v49, 0.0  ;;  %vm540_vm5 = vcmp.gt.f32.partialorder %v1031_v48, %v1026_v46  ;;  %v392_v58 = vmul.f32 %v1016_v41, %v1016_v41 }
 0x102   : > { %850 = vrsqrt.f32 %v1039_v51  ;;  %v464_v55 = vsel %vm459_vm4, 1.0, %v449_v49  ;;  %v1060_v59 = vand.u32 2147483647, %v1016_v41  ;;  %vm460_vm6 = vcmp.eq.f32.partialorder %v450_v56, 0.0 }
 0x103   : > { %852 = vrcp.f32 %v464_v55  ;;  %v391_v61 = vmul.f32 %v1023_v45, %v1023_v45  ;;  %v1068_v62 = vand.u32 2147483647, %v1023_v45  ;;  %v465_v0 = vsel %vm460_vm6, 1.0, %v450_v56 }
 0x104   : > { %v1070_v1 = vadd.f32 %v392_v58, %v387_v52  ;;  %v447_v2 = vmax.f32 %v1045_v53, %v1060_v59  ;;  %v452_v3 = vmin.f32 %v1045_v53, %v1060_v59  ;;  %854 = vrcp.f32 %v465_v0 }
 0x105   : > { %vm537_vm7 = vcmp.gt.f32.partialorder %v1060_v59, %v1045_v53  ;;  %v1079_v5 = vadd.f32 %v396_v54, %v391_v61  ;;  %v414_v6 = vand.u32 2147483648, %v994_v32  ;;  %vm413_vm10 = vcmp.eq.f32.partialorder %v994_v32, 0.0 }
 0x106   : > { %856 = vrsqrt.f32 %v1070_v1  ;;  %vm457_vm11 = vcmp.eq.f32.partialorder %v447_v2, 0.0  ;;  %vm418_vm12 = vcmp.eq.f32.partialorder %v1028_v47, inf  ;;  %vm420_vm13 = vcmp.eq.f32.partialorder %v1028_v47, 0.0 }
 0x107   : > { %v845_v63 = vpop.eup %844  ;;  %858 = vrsqrt.f32 %v1079_v5  ;;  %v462_v11 = vsel %vm457_vm11, 1.0, %v447_v2  ;;  %v451_v13 = vmax.f32 %v1068_v62, %v1063_v60  ;;  %v456_v14 = vmin.f32 %v1068_v62, %v1063_v60 }
 0x108   : > { %v410_v4 = vmul.f32 %v845_v63, %v994_v32  ;;  %860 = vrcp.f32 %v462_v11  ;;  %v421_v18 = vand.u32 2147483648, %v1028_v47  ;;  %vm541_vm14 = vcmp.gt.f32.partialorder %v1063_v60, %v1068_v62 }
 0x109   : > { %v847_v7 = vpop.eup %846  ;;  %vm425_vm15 = vcmp.eq.f32.partialorder %v1039_v51, inf  ;;  %vm427_vm0 = vcmp.eq.f32.partialorder %v1039_v51, 0.0  ;;  %vm461_vm2 = vcmp.eq.f32.partialorder %v451_v13, 0.0  ;;  %v428_v28 = vand.u32 2147483648, %v1039_v51 }
 0x10a   : > { %v412_v8 = vsel %vm411_vm8, %v994_v32, %v410_v4  ;;  %v1094_v10 = vmul.f32 %v847_v7, %v453_v34  ;;  %v466_v32 = vsel %vm461_vm2, 1.0, %v451_v13  ;;  %vm587_vm4 = vcmask 147456  }
 0x10b   : > { %v415_v9 = vsel %vm413_vm10, %v414_v6, %v412_v8  ;;  %v849_v12 = vpop.eup %848  ;;  %862 = vrcp.f32 %v466_v32  ;;  %vm404_vm6 = vcmp.eq.f32.partialorder %v1070_v1, inf  ;;  %vm406_vm8 = vcmp.eq.f32.partialorder %v1070_v1, 0.0 }
 0x10c   : > { %584 = vst.msk [vmem:[%s1086_s20 + $0x8] sm:$0xff] %vm582_vm9, %v415_v9  ;;  %v851_v15 = vpop.eup %850  ;;  %v1106_v16 = vmul.f32 %v1094_v10, %v1094_v10  ;;  %v417_v17 = vmul.f32 %v849_v12, %v1028_v47  ;;  %v407_v58 = vand.u32 2147483648, %v1070_v1  ;;  %vm432_vm10 = vcmp.eq.f32.partialorder %v1079_v5, inf }
 0x10d   : > { %v424_v19 = vmul.f32 %v851_v15, %v1039_v51  ;;  %v853_v20 = vpop.eup %852  ;;  %v435_v2 = vand.u32 2147483648, %v1079_v5  ;;  %vm434_vm11 = vcmp.eq.f32.partialorder %v1079_v5, 0.0  ;;  %vm567_vm2 = vcmp.lt.f32.partialorder %v1016_v41, 0.0 }
 0x10e   : > { %v483_v21 = vmul.f32 -0.0117212, %v1106_v16  ;;  %v419_v24 = vsel %vm418_vm12, %v1028_v47, %v417_v17  ;;  %v1125_v34 = vmul.f32 %v853_v20, %v454_v50  ;;  %v855_v42 = vpop.eup %854  ;;  %vm553_vm12 = vcmp.lt.f32.partialorder %v972_v22, 0.0 }
 0x10f   : > { %v422_v33 = vsel %vm420_vm13, %v421_v18, %v419_v24  ;;  %v426_v37 = vsel %vm425_vm15, %v1039_v51, %v424_v19  ;;  %v1138_v50 = vmul.f32 %v855_v42, %v455_v57  ;;  %vm554_vm13 = vcmp.lt.f32.partialorder %v1002_v35, 0.0 }
 0x110   : > { %v488_v39 = vadd.f32 0.05265332, %v483_v21  ;;  %585 = vst.msk [vmem:[%s1086_s20 + $0x10] sm:$0xff] %vm582_vm9, %v422_v33  ;;  %v429_v40 = vsel %vm427_vm0, %v428_v28, %v426_v37  ;;  %v479_v44 = vmul.f32 %v1125_v34, %v1125_v34  ;;  %v857_v47 = vpop.eup %856  ;;  %vm555_vm15 = vcmp.lt.f32.partialorder %v990_v30, 0.0 }
 0x111   : > { %586 = vst.msk [vmem:[%s1086_s20 + $0x18] sm:$0xff] %vm582_vm9, %v429_v40  ;;  %v859_v51 = vpop.eup %858  ;;  %v403_v54 = vmul.f32 %v857_v47, %v1070_v1  ;;  %v480_v56 = vmul.f32 %v1138_v50, %v1138_v50  ;;  %vm552_vm0 = vcmp.lt.f32.partialorder %v981_v26, 0.0 }
 0x112   : > { %v493_v49 = vmul.f32 %v488_v39, %v1106_v16  ;;  %v484_v52 = vmul.f32 -0.0117212, %v479_v44  ;;  %v431_v61 = vmul.f32 %v859_v51, %v1079_v5  ;;  %v861_v57 = vpop.eup %860 }
 0x113   : > { %v405_v0 = vsel %vm404_vm6, %v1070_v1, %v403_v54  ;;  %v485_v6 = vmul.f32 -0.0117212, %v480_v56  ;;  %v1154_v8 = vmul.f32 %v861_v57, %v452_v3  ;;  %vm571_vm6 = vcmp.lt.f32.partialorder %v992_v31, 0.0 }
 0x114   : > { %v498_v55 = vadd.f32 -0.11643287, %v493_v49  ;;  %v489_v63 = vadd.f32 0.05265332, %v484_v52  ;;  %v408_v7 = vsel %vm406_vm8, %v407_v58, %v405_v0  ;;  %v433_v11 = vsel %vm432_vm10, %v1079_v5, %v431_v61 }
 0x115   : > { %583 = vst.msk [vmem:[%s1086_s20] sm:$0xff] %vm582_vm9, %v408_v7  ;;  %v490_v12 = vadd.f32 0.05265332, %v485_v6  ;;  %v477_v13 = vmul.f32 %v1154_v8, %v1154_v8  ;;  %v436_v15 = vsel %vm434_vm11, %v435_v2, %v433_v11  ;;  %v863_v17 = vpop.eup %862 }
 0x116   : > { %v503_v4 = vmul.f32 %v498_v55, %v1106_v16  ;;  %v494_v9 = vmul.f32 %v489_v63, %v479_v44  ;;  %588 = vst.msk [vmem:[%s1086_s20 + $0x20] sm:$0x1] %vm587_vm4, %v436_v15  ;;  %v1165_v21 = vmul.f32 %v863_v17, %v456_v14 }
 0x117   : > { %v495_v19 = vmul.f32 %v490_v12, %v480_v56  ;;  %v482_v20 = vmul.f32 -0.0117212, %v477_v13 }
 0x118   : > { %v508_v1 = vadd.f32 0.19354346, %v503_v4  ;;  %v499_v18 = vadd.f32 -0.11643287, %v494_v9  ;;  %v481_v33 = vmul.f32 %v1165_v21, %v1165_v21 }
 0x119   : > { %v500_v32 = vadd.f32 -0.11643287, %v495_v19  ;;  %v487_v5 = vadd.f32 0.05265332, %v482_v20 }
 0x11a   : > { %v513_v3 = vmul.f32 %v508_v1, %v1106_v16  ;;  %v504_v24 = vmul.f32 %v499_v18, %v479_v44  ;;  %v486_v47 = vmul.f32 -0.0117212, %v481_v33 }
 0x11b   : > { %v505_v40 = vmul.f32 %v500_v32, %v480_v56  ;;  %v492_v42 = vmul.f32 %v487_v5, %v477_v13 }
 0x11c   : > { %v518_v28 = vadd.f32 -0.33262348, %v513_v3  ;;  %v509_v37 = vadd.f32 0.19354346, %v504_v24  ;;  %v491_v14 = vadd.f32 0.05265332, %v486_v47 }
 0x11d   : > { %v510_v52 = vadd.f32 0.19354346, %v505_v40  ;;  %v497_v54 = vadd.f32 -0.11643287, %v492_v42 }
 0x11e   : > { %v523_v39 = vmul.f32 %v518_v28, %v1106_v16  ;;  %v514_v49 = vmul.f32 %v509_v37, %v479_v44  ;;  %v496_v0 = vmul.f32 %v491_v14, %v481_v33 }
 0x11f   : > { %v515_v61 = vmul.f32 %v510_v52, %v480_v56  ;;  %v502_v57 = vmul.f32 %v497_v54, %v477_v13 }
 0x120   : > { %v528_v51 = vadd.f32 0.99997723, %v523_v39  ;;  %v519_v55 = vadd.f32 -0.33262348, %v514_v49  ;;  %v501_v7 = vadd.f32 -0.11643287, %v496_v0 }
 0x121   : > { %v520_v4 = vadd.f32 -0.33262348, %v515_v61  ;;  %v507_v6 = vadd.f32 0.19354346, %v502_v57 }
 0x122   : > { %v533_v58 = vmul.f32 %v528_v51, %v1094_v10  ;;  %v524_v63 = vmul.f32 %v519_v55, %v479_v44  ;;  %v506_v10 = vmul.f32 %v501_v7, %v481_v33 }
 0x123   : > { %v525_v11 = vmul.f32 %v520_v4, %v480_v56  ;;  %v512_v1 = vmul.f32 %v507_v6, %v477_v13 }
 0x124   : > { %v543_v2 = vsub.f32 1.5707964, %v533_v58  ;;  %v529_v16 = vadd.f32 0.99997723, %v524_v63  ;;  %v511_v19 = vadd.f32 0.19354346, %v506_v10 }
 0x125   : > { %v530_v44 = vadd.f32 0.99997723, %v525_v11  ;;  %v517_v17 = vadd.f32 -0.33262348, %v512_v1 }
 0x126   : > { %v548_v9 = vsel %vm538_vm1, %v543_v2, %v533_v58  ;;  %v534_v15 = vmul.f32 %v529_v16, %v1125_v34  ;;  %vm568_vm1 = vcmp.lt.f32.partialorder %v983_v27, 0.0  ;;  %v516_v34 = vmul.f32 %v511_v19, %v481_v33 }
 0x127   : > { %v558_v12 = vsub.f32 3.1415927, %v548_v9  ;;  %v535_v29 = vmul.f32 %v530_v44, %v1138_v50  ;;  %v522_v56 = vmul.f32 %v517_v17, %v477_v13 }
 0x128   : > { %v544_v3 = vsub.f32 1.5707964, %v534_v15  ;;  %v521_v5 = vadd.f32 -0.33262348, %v516_v34 }
 0x129   : > { %v563_v18 = vsel %vm553_vm12, %v558_v12, %v548_v9  ;;  %v545_v28 = vsub.f32 1.5707964, %v535_v29  ;;  %v527_v32 = vadd.f32 0.99997723, %v522_v56 }
 0x12a   : > { %v573_v25 = vsub.f32 0.0, %v563_v18  ;;  %v549_v22 = vsel %vm539_vm3, %v544_v3, %v534_v15  ;;  %v526_v13 = vmul.f32 %v521_v5, %v481_v33  ;;  %vm569_vm3 = vcmp.lt.f32.partialorder %v974_v23, 0.0 }
 0x12b   : > { %v559_v24 = vsub.f32 3.1415927, %v549_v22  ;;  %v550_v27 = vsel %vm540_vm5, %v545_v28, %v535_v29  ;;  %v532_v50 = vmul.f32 %v527_v32, %v1154_v8  ;;  %vm570_vm5 = vcmp.lt.f32.partialorder %v1004_v36, 0.0 }
 0x12c   : > { %v578_v20 = vsel %vm568_vm1, %v573_v25, %v563_v18  ;;  %v560_v43 = vsub.f32 3.1415927, %v550_v27  ;;  %v531_v35 = vadd.f32 0.99997723, %v526_v13 }
 0x12d   : > { %590 = vst.msk [vmem:[%s1181_s23 + $0x8] sm:$0xff] %vm582_vm9, %v578_v20  ;;  %v564_v37 = vsel %vm554_vm13, %v559_v24, %v549_v22  ;;  %v542_v39 = vsub.f32 1.5707964, %v532_v50 }
 0x12e   : > { %v574_v38 = vsub.f32 0.0, %v564_v37  ;;  %v565_v42 = vsel %vm555_vm15, %v560_v43, %v550_v27  ;;  %v536_v8 = vmul.f32 %v531_v35, %v1165_v21 }
 0x12f   : > { %v575_v47 = vsub.f32 0.0, %v565_v42  ;;  %v547_v46 = vsel %vm537_vm7, %v542_v39, %v532_v50  ;;  %vm556_vm7 = vcmp.lt.f32.partialorder %v1023_v45, 0.0 }
 0x130   : > { %v579_v40 = vsel %vm569_vm3, %v574_v38, %v564_v37  ;;  %v557_v48 = vsub.f32 3.1415927, %v547_v46  ;;  %v546_v33 = vsub.f32 1.5707964, %v536_v8 }
 0x131   : > { %591 = vst.msk [vmem:[%s1181_s23 + $0x10] sm:$0xff] %vm582_vm9, %v579_v40  ;;  %v580_v23 = vsel %vm570_vm5, %v575_v47, %v565_v42 }
 0x132   : > { %592 = vst.msk [vmem:[%s1181_s23 + $0x18] sm:$0xff] %vm582_vm9, %v580_v23  ;;  %v562_v30 = vsel %vm552_vm0, %v557_v48, %v547_v46  ;;  %v551_v53 = vsel %vm541_vm14, %v546_v33, %v536_v8 }
 0x133   : > { %v572_v49 = vsub.f32 0.0, %v562_v30  ;;  %v561_v36 = vsub.f32 3.1415927, %v551_v53 }
 0x135   : > { %v577_v59 = vsel %vm567_vm2, %v572_v49, %v562_v30  ;;  %v566_v26 = vsel %vm556_vm7, %v561_v36, %v551_v53 }
 0x136   : > { %589 = vst.msk [vmem:[%s1181_s23] sm:$0xff] %vm582_vm9, %v577_v59  ;;  %v576_v21 = vsub.f32 0.0, %v566_v26 }
 0x138   : > { %v581_v51 = vsel %vm571_vm6, %v576_v21, %v566_v26 }
 0x139   : > { %593 = vst.msk [vmem:[%s1181_s23 + $0x20] sm:$0x1] %vm587_vm4, %v581_v51 }
 0x13a PF: > { %s14_s14 = sadd.s32 1, %s886_s14   ;;  %s1230_s12 = smov %s882_s13 }
 0x13b   : > { %p11_p5 = scmp.ge.s32.totalorder %s14_s14, 4   ;;  %s1231_s13 = smov %s1233_s15 }
 0x13d   :  { %13 = sbr.rel (!%p11_p5) target bundleno = 2 (0x2), region = 70 }

</bundles_post_ra>
